<compile_context>
chip_gen: v6e
topology: v6e:2x2x1
jax: 0.10.0
libtpu: 0.0.40
codegen_flags: <defaults>
</compile_context>

<pallas_src>
import functools

import jax
import jax.numpy as jnp
from jax.experimental import pallas as pl
from jax.experimental.pallas import tpu as pltpu


def _attn_petl_kernel(blur_ref, tc_ref,                        # scalar prefetch (SMEM)
                      x_ref, wq_ref, wkv_ref, wp_ref, bp_ref,  # inputs
                      out_ref, attn_ref,                       # outputs
                      kv_scr, q_scr, acc_scr,                  # VMEM scratch
                      *, num_heads, head_dim, seq_len, q_tile,
                      blur_enabled, compute_dtype):
    H, Hd, N, tq = num_heads, head_dim, seq_len, q_tile
    C = H * Hd
    cdt = compute_dtype
    qt = pl.program_id(1)

    # ---- lane-dense projections into VMEM scratch -------------------------
    # TODO(synk): when N // tq > 1 the K/V projection is recomputed per q-tile;
    # hoisting it needs an "arbitrary" qt axis (scratch reuse), traded here for
    # megacore parallelism.
    x_full = x_ref[...].astype(cdt)                                   # (N, C)
    kv_scr[...] = jnp.dot(x_full, wkv_ref[...],
                          preferred_element_type=jnp.float32).astype(cdt)
    if tq == N:
        x_tile = x_full
    else:
        q_start = pl.multiple_of(qt * tq, tq)
        x_tile = x_ref[pl.ds(q_start, tq), :].astype(cdt)             # (tq, C)
    q_scr[...] = jnp.dot(x_tile, wq_ref[...],                         # scale folded in
                         preferred_element_type=jnp.float32).astype(cdt)

    if blur_enabled:
        # hoisted out of the head loop
        row_ids = qt * tq + jax.lax.broadcasted_iota(jnp.int32, (tq, N), 0)
        row_is_target = row_ids == tc_ref[0]

    # ---- per-head attention (static unrolled loop; static lane slices) ----
    for h in range(H):
        q_h = q_scr[:, h * Hd:(h + 1) * Hd]                           # (tq, Hd)
        k_h = kv_scr[:, h * Hd:(h + 1) * Hd]                          # (N, Hd)
        v_h = kv_scr[:, C + h * Hd:C + (h + 1) * Hd]                  # (N, Hd)

        # q @ k^T without an explicit transpose
        s = jax.lax.dot_general(q_h, k_h, (((1,), (1,)), ((), ())),
                                preferred_element_type=jnp.float32)   # (tq, N)

        if blur_enabled:
            do_blur = blur_ref[h] != 0
            s = jnp.where(jnp.logical_and(do_blur, row_is_target), 0.0, s)

        # softmax (row-wise); normalize with a reciprocal-multiply (EUP) not a divide
        s = s - jnp.max(s, axis=-1, keepdims=True)
        e = jnp.exp(s)
        p = e * pl.reciprocal(jnp.sum(e, axis=-1, keepdims=True), approx=False)

        attn_ref[h] = p.astype(attn_ref.dtype)                        # (tq, N)

        o = jnp.dot(p.astype(cdt), v_h,
                    preferred_element_type=jnp.float32)               # (tq, Hd)
        acc_scr[:, h * Hd:(h + 1) * Hd] = o.astype(cdt)               # head concat

    # ---- single C-deep output projection -----------------------------------
    proj = jnp.dot(acc_scr[...], wp_ref[...],
                   preferred_element_type=jnp.float32)                # (tq, C)
    out_ref[...] = (proj + bp_ref[...]).astype(out_ref.dtype)


def _pick_q_tile(N):
    for cand in (512, 256, 128):
        if N > cand and N % cand == 0:
            return cand
    return N


def attention_petl(x, qkv_weight, proj_weight, proj_bias, num_heads,
                   blur_head_lst=(), target_cls=-1,
                   compute_dtype=jnp.bfloat16, attn_dtype=None):
    """Pallas implementation of AttentionPETL.forward.

    x:           (B, N, C) float32
    qkv_weight:  (3C, C)   (PyTorch nn.Linear weight layout, no bias)
    proj_weight: (C, C)
    proj_bias:   (C,)
    Returns (x_out (B,N,C) in x.dtype, attn (B,H,N,N) in attn_dtype).
    """
    B, N, C = x.shape
    H = num_heads
    Hd = C // H
    scale = float(Hd) ** -0.5
    if attn_dtype is None:
        attn_dtype = compute_dtype

    # ---- one-time weight glue ----------------------------------------------
    # qkv(x) = x @ W^T; the 3C axis splits as [q | k | v], heads contiguous.
    w_t = qkv_weight.T                                            # (C, 3C)
    wq = (w_t[:, :C] * scale).astype(compute_dtype)               # (C, C), scale folded
    wkv = w_t[:, C:].astype(compute_dtype)                        # (C, 2C)  [k | v]
    wp = proj_weight.T.astype(compute_dtype)                      # (C, C)
    bp = proj_bias.reshape(1, C).astype(jnp.float32)

    blur_enabled = len(blur_head_lst) != 0
    blur_flags = jnp.zeros((H,), jnp.int32)
    for hh in blur_head_lst:
        blur_flags = blur_flags.at[int(hh)].set(1)
    tc = jnp.array([int(target_cls) % N], jnp.int32)              # wrap negatives

    tq = _pick_q_tile(N)
    QT = N // tq

    kernel = functools.partial(
        _attn_petl_kernel, num_heads=H, head_dim=Hd, seq_len=N, q_tile=tq,
        blur_enabled=blur_enabled, compute_dtype=compute_dtype)

    # ---- explicit VMEM budget ----------------------------------------------
    cdt_b = jnp.dtype(compute_dtype).itemsize
    attn_b = jnp.dtype(attn_dtype).itemsize
    est = 2 * (N * C * x.dtype.itemsize                 # x block (double buffered)
               + 3 * C * C * cdt_b + C * 4              # resident weights + bias
               + tq * C * x.dtype.itemsize              # out block
               + H * tq * N * attn_b)                   # attn block
    est += (2 * N * C + 2 * tq * C) * cdt_b             # scratch
    vmem_limit = int(min(max(est * 3 // 2, 16 * 2**20), 60 * 2**20))

    grid_spec = pltpu.PrefetchScalarGridSpec(
        num_scalar_prefetch=2,
        grid=(B, QT),
        in_specs=[
            pl.BlockSpec((None, N, C), lambda b, qt, *_: (b, 0, 0)),   # x (per batch)
            pl.BlockSpec((C, C),       lambda b, qt, *_: (0, 0)),      # Wq (resident)
            pl.BlockSpec((C, 2 * C),   lambda b, qt, *_: (0, 0)),      # Wkv (resident)
            pl.BlockSpec((C, C),       lambda b, qt, *_: (0, 0)),      # Wp (resident)
            pl.BlockSpec((1, C),       lambda b, qt, *_: (0, 0)),      # bias (resident)
        ],
        out_specs=[
            pl.BlockSpec((None, tq, C),    lambda b, qt, *_: (b, qt, 0)),     # x_out
            pl.BlockSpec((None, H, tq, N), lambda b, qt, *_: (b, 0, qt, 0)),  # attn
        ],
        scratch_shapes=[
            pltpu.VMEM((N, 2 * C), compute_dtype),   # [k | v] for the whole sequence
            pltpu.VMEM((tq, C), compute_dtype),      # q for this query tile
            pltpu.VMEM((tq, C), compute_dtype),      # head-concat attention output
        ],
    )

    return pl.pallas_call(
        kernel,
        grid_spec=grid_spec,
        out_shape=(
            jax.ShapeDtypeStruct((B, N, C), x.dtype),
            jax.ShapeDtypeStruct((B, H, N, N), attn_dtype),
        ),
        compiler_params=pltpu.CompilerParams(
            dimension_semantics=("parallel", "parallel"),
            vmem_limit_bytes=vmem_limit),
    )(blur_flags, tc, x, wq, wkv, wp, bp)


# ---------------- pure-JAX reference (mirrors the PyTorch forward) ----------------
def attention_petl_ref(x, qkv_weight, proj_weight, proj_bias, num_heads,
                       blur_head_lst=(), target_cls=-1):
    B, N, C = x.shape
    H = num_heads
    Hd = C // H
    qkv = x @ qkv_weight.T                                    # (B, N, 3C)
    qkv = qkv.reshape(B, N, 3, H, Hd).transpose(2, 0, 3, 1, 4)
    q, k, v = qkv[0], qkv[1], qkv[2]                          # (B, H, N, Hd)
    q = q * (Hd ** -0.5)
    attn = q @ jnp.swapaxes(k, -2, -1)                        # (B, H, N, N)
    if len(blur_head_lst) != 0:
        attn = attn.at[:, jnp.array(list(blur_head_lst)), target_cls, :].set(0.0)
    attn = jax.nn.softmax(attn, axis=-1)
    xo = attn @ v                                             # (B, H, N, Hd)
    xo = jnp.swapaxes(xo, 1, 2).reshape(B, N, C)
    xo = xo @ proj_weight.T + proj_bias
    return xo, attn


if __name__ == "__main__":
    B, N, C, H = 2, 8, 32, 4   # head_dim = 8

    key = jax.random.PRNGKey(0)
    kx, kqkv, kp, kb = jax.random.split(key, 4)
    x = jax.random.normal(kx, (B, N, C), jnp.float32)
    qkv_weight = jax.random.normal(kqkv, (3 * C, C), jnp.float32) * 0.05
    proj_weight = jax.random.normal(kp, (C, C), jnp.float32) * 0.05
    proj_bias = jax.random.normal(kb, (C,), jnp.float32) * 0.05

    ok = True
    # includes a blur with negative target_cls to exercise the index-wrapping fix
    for blur, tc in [((), -1), ((1, 3), 2), ((0, 2), -1)]:
        out_ref, attn_ref = attention_petl_ref(x, qkv_weight, proj_weight,
                                               proj_bias, H,
                                               blur_head_lst=blur, target_cls=tc)

        # exact path: f32 MXU operands / f32 attn writeback
        out32, attn32 = attention_petl(x, qkv_weight, proj_weight, proj_bias, H,
                                       blur_head_lst=blur, target_cls=tc,
                                       compute_dtype=jnp.float32,
                                       attn_dtype=jnp.float32)
        jax.block_until_ready((out32, attn32))
        ok &= bool(jnp.allclose(out32, out_ref, rtol=1e-4, atol=1e-4))
        ok &= bool(jnp.allclose(attn32, attn_ref, rtol=1e-4, atol=1e-4))

        # fast path: bf16 MXU operands, f32 accumulation, bf16 attn writeback
        out16, attn16 = attention_petl(x, qkv_weight, proj_weight, proj_bias, H,
                                       blur_head_lst=blur, target_cls=tc)
        jax.block_until_ready((out16, attn16))
        ok &= bool(jnp.allclose(out16, out_ref, rtol=5e-2, atol=5e-2))
        ok &= bool(jnp.allclose(attn16.astype(jnp.float32), attn_ref,
                                rtol=5e-2, atol=5e-2))

    print("KERNEL_OK" if ok else "MISMATCH")
</pallas_src>

<mosaic_0001>
module attributes {stable_mosaic.version = 11 : i64} {
  func.func @_attn_petl_kernel(%arg0: i32, %arg1: i32, %arg2: memref<4xi32, #tpu.memory_space<smem>>, %arg3: memref<1xi32, #tpu.memory_space<smem>>, %arg4: memref<1x8x32xf32, #tpu.memory_space<vmem>>, %arg5: memref<32x32xf32, #tpu.memory_space<vmem>>, %arg6: memref<32x64xf32, #tpu.memory_space<vmem>>, %arg7: memref<32x32xf32, #tpu.memory_space<vmem>>, %arg8: memref<1x32xf32, #tpu.memory_space<vmem>>, %arg9: memref<1x8x32xf32, #tpu.memory_space<vmem>>, %arg10: memref<1x4x8x8xf32, #tpu.memory_space<vmem>>, %arg11: memref<8x64xf32, #tpu.memory_space<vmem>>, %arg12: memref<8x32xf32, #tpu.memory_space<vmem>>, %arg13: memref<8x32xf32, #tpu.memory_space<vmem>>) attributes {dimension_semantics = [#tpu.dimension_semantics<parallel>, #tpu.dimension_semantics<parallel>], iteration_bounds = array<i64: 2, 1>, scalar_prefetch = 2 : i64, scratch_operands = 3 : i64, tpu.core_type = #tpu.core_type<tc>, window_params = [{transform_indices = @transform_0, window_bounds = array<i64: 1, 8, 32>}, {pipeline_mode = #tpu.pipeline_mode<synchronous>, transform_indices = @transform_1, window_bounds = array<i64: 32, 32>}, {pipeline_mode = #tpu.pipeline_mode<synchronous>, transform_indices = @transform_2, window_bounds = array<i64: 32, 64>}, {pipeline_mode = #tpu.pipeline_mode<synchronous>, transform_indices = @transform_3, window_bounds = array<i64: 32, 32>}, {pipeline_mode = #tpu.pipeline_mode<synchronous>, transform_indices = @transform_4, window_bounds = array<i64: 1, 32>}, {transform_indices = @transform_5, window_bounds = array<i64: 1, 8, 32>}, {transform_indices = @transform_6, window_bounds = array<i64: 1, 4, 8, 8>}]} {
    %c0 = arith.constant 0 : index
    %c0_0 = arith.constant 0 : index
    %c0_1 = arith.constant 0 : index
    %0 = vector.load %arg4[%c0, %c0_0, %c0_1] : memref<1x8x32xf32, #tpu.memory_space<vmem>>, vector<1x8x32xf32>
    %1 = vector.shape_cast %0 : vector<1x8x32xf32> to vector<8x32xf32>
    %c0_2 = arith.constant 0 : index
    %c0_3 = arith.constant 0 : index
    %2 = vector.load %arg6[%c0_2, %c0_3] : memref<32x64xf32, #tpu.memory_space<vmem>>, vector<32x64xf32>
    %cst = arith.constant dense<0.000000e+00> : vector<8x64xf32>
    %3 = tpu.matmul %1, %2, %cst {dimension_numbers = #tpu.dot_dimension_numbers<[1], [0], [0], [1], [0, 0, 1, 1], [], []>} : vector<8x32xf32>, vector<32x64xf32>, vector<8x64xf32> -> vector<8x64xf32>
    %c0_4 = arith.constant 0 : index
    %c0_5 = arith.constant 0 : index
    %4 = vector.load %arg11[%c0_4, %c0_5] : memref<8x64xf32, #tpu.memory_space<vmem>>, vector<8x64xf32>
    tpu.vector_store %arg11[%c0_4, %c0_5], %3 {strides = array<i32>} : memref<8x64xf32, #tpu.memory_space<vmem>>, vector<8x64xf32>,
    %c0_6 = arith.constant 0 : index
    %c0_7 = arith.constant 0 : index
    %5 = vector.load %arg5[%c0_6, %c0_7] : memref<32x32xf32, #tpu.memory_space<vmem>>, vector<32x32xf32>
    %cst_8 = arith.constant dense<0.000000e+00> : vector<8x32xf32>
    %6 = tpu.matmul %1, %5, %cst_8 {dimension_numbers = #tpu.dot_dimension_numbers<[1], [0], [0], [1], [0, 0, 1, 1], [], []>} : vector<8x32xf32>, vector<32x32xf32>, vector<8x32xf32> -> vector<8x32xf32>
    %c0_9 = arith.constant 0 : index
    %c0_10 = arith.constant 0 : index
    %7 = vector.load %arg12[%c0_9, %c0_10] : memref<8x32xf32, #tpu.memory_space<vmem>>, vector<8x32xf32>
    tpu.vector_store %arg12[%c0_9, %c0_10], %6 {strides = array<i32>} : memref<8x32xf32, #tpu.memory_space<vmem>>, vector<8x32xf32>,
    %c0_11 = arith.constant 0 : index
    %c0_12 = arith.constant 0 : index
    %8 = vector.load %arg12[%c0_11, %c0_12] : memref<8x32xf32, #tpu.memory_space<vmem>>, vector<8x8xf32>
    %c0_13 = arith.constant 0 : index
    %c0_14 = arith.constant 0 : index
    %9 = vector.load %arg11[%c0_13, %c0_14] : memref<8x64xf32, #tpu.memory_space<vmem>>, vector<8x8xf32>
    %c0_15 = arith.constant 0 : index
    %c32 = arith.constant 32 : index
    %10 = vector.load %arg11[%c0_15, %c32] : memref<8x64xf32, #tpu.memory_space<vmem>>, vector<8x8xf32>
    %cst_16 = arith.constant dense<0.000000e+00> : vector<8x8xf32>
    %11 = tpu.matmul %8, %9, %cst_16 {dimension_numbers = #tpu.dot_dimension_numbers<[1], [1], [0], [0], [0, 0, 1, 0], [], []>} : vector<8x8xf32>, vector<8x8xf32>, vector<8x8xf32> -> vector<8x8xf32>
    %cst_17 = arith.constant dense<0xFF800000> : vector<8xf32>
    %12 = vector.multi_reduction <maximumf>, %11, %cst_17 [1] : vector<8x8xf32> to vector<8xf32>
    %13 = vector.shape_cast %12 : vector<8xf32> to vector<8x1xf32>
    %14 = vector.broadcast %13 : vector<8x1xf32> to vector<8x8xf32>
    %15 = arith.subf %11, %14 : vector<8x8xf32>
    %16 = math.exp %15 : vector<8x8xf32>
    %cst_18 = arith.constant dense<0.000000e+00> : vector<8xf32>
    %17 = vector.multi_reduction <add>, %16, %cst_18 [1] : vector<8x8xf32> to vector<8xf32>
    %18 = vector.shape_cast %17 : vector<8xf32> to vector<8x1xf32>
    %19 = tpu.reciprocal %18 : vector<8x1xf32> -> vector<8x1xf32>
    %20 = vector.broadcast %19 : vector<8x1xf32> to vector<8x8xf32>
    %21 = arith.mulf %16, %20 : vector<8x8xf32>
    %c0_19 = arith.constant 0 : index
    %c0_20 = arith.constant 0 : index
    %c0_21 = arith.constant 0 : index
    %c0_22 = arith.constant 0 : index
    %22 = vector.load %arg10[%c0_19, %c0_20, %c0_21, %c0_22] : memref<1x4x8x8xf32, #tpu.memory_space<vmem>>, vector<1x1x8x8xf32>
    %23 = vector.shape_cast %22 : vector<1x1x8x8xf32> to vector<8x8xf32>
    %24 = vector.shape_cast %21 : vector<8x8xf32> to vector<1x1x8x8xf32>
    tpu.vector_store %arg10[%c0_19, %c0_20, %c0_21, %c0_22], %24 {strides = array<i32>} : memref<1x4x8x8xf32, #tpu.memory_space<vmem>>, vector<1x1x8x8xf32>,
    %cst_23 = arith.constant dense<0.000000e+00> : vector<8x8xf32>
    %25 = tpu.matmul %21, %10, %cst_23 {dimension_numbers = #tpu.dot_dimension_numbers<[1], [0], [0], [1], [0, 0, 1, 1], [], []>} : vector<8x8xf32>, vector<8x8xf32>, vector<8x8xf32> -> vector<8x8xf32>
    %c0_24 = arith.constant 0 : index
    %c0_25 = arith.constant 0 : index
    %26 = vector.load %arg13[%c0_24, %c0_25] : memref<8x32xf32, #tpu.memory_space<vmem>>, vector<8x8xf32>
    tpu.vector_store %arg13[%c0_24, %c0_25], %25 {strides = array<i32>} : memref<8x32xf32, #tpu.memory_space<vmem>>, vector<8x8xf32>,
    %c0_26 = arith.constant 0 : index
    %c8 = arith.constant 8 : index
    %27 = vector.load %arg12[%c0_26, %c8] : memref<8x32xf32, #tpu.memory_space<vmem>>, vector<8x8xf32>
    %c0_27 = arith.constant 0 : index
    %c8_28 = arith.constant 8 : index
    %28 = vector.load %arg11[%c0_27, %c8_28] : memref<8x64xf32, #tpu.memory_space<vmem>>, vector<8x8xf32>
    %c0_29 = arith.constant 0 : index
    %c40 = arith.constant 40 : index
    %29 = vector.load %arg11[%c0_29, %c40] : memref<8x64xf32, #tpu.memory_space<vmem>>, vector<8x8xf32>
    %cst_30 = arith.constant dense<0.000000e+00> : vector<8x8xf32>
    %30 = tpu.matmul %27, %28, %cst_30 {dimension_numbers = #tpu.dot_dimension_numbers<[1], [1], [0], [0], [0, 0, 1, 0], [], []>} : vector<8x8xf32>, vector<8x8xf32>, vector<8x8xf32> -> vector<8x8xf32>
    %cst_31 = arith.constant dense<0xFF800000> : vector<8xf32>
    %31 = vector.multi_reduction <maximumf>, %30, %cst_31 [1] : vector<8x8xf32> to vector<8xf32>
    %32 = vector.shape_cast %31 : vector<8xf32> to vector<8x1xf32>
    %33 = vector.broadcast %32 : vector<8x1xf32> to vector<8x8xf32>
    %34 = arith.subf %30, %33 : vector<8x8xf32>
    %35 = math.exp %34 : vector<8x8xf32>
    %cst_32 = arith.constant dense<0.000000e+00> : vector<8xf32>
    %36 = vector.multi_reduction <add>, %35, %cst_32 [1] : vector<8x8xf32> to vector<8xf32>
    %37 = vector.shape_cast %36 : vector<8xf32> to vector<8x1xf32>
    %38 = tpu.reciprocal %37 : vector<8x1xf32> -> vector<8x1xf32>
    %39 = vector.broadcast %38 : vector<8x1xf32> to vector<8x8xf32>
    %40 = arith.mulf %35, %39 : vector<8x8xf32>
    %c0_33 = arith.constant 0 : index
    %c1 = arith.constant 1 : index
    %c0_34 = arith.constant 0 : index
    %c0_35 = arith.constant 0 : index
    %41 = vector.load %arg10[%c0_33, %c1, %c0_34, %c0_35] : memref<1x4x8x8xf32, #tpu.memory_space<vmem>>, vector<1x1x8x8xf32>
    %42 = vector.shape_cast %41 : vector<1x1x8x8xf32> to vector<8x8xf32>
    %43 = vector.shape_cast %40 : vector<8x8xf32> to vector<1x1x8x8xf32>
    tpu.vector_store %arg10[%c0_33, %c1, %c0_34, %c0_35], %43 {strides = array<i32>} : memref<1x4x8x8xf32, #tpu.memory_space<vmem>>, vector<1x1x8x8xf32>,
    %cst_36 = arith.constant dense<0.000000e+00> : vector<8x8xf32>
    %44 = tpu.matmul %40, %29, %cst_36 {dimension_numbers = #tpu.dot_dimension_numbers<[1], [0], [0], [1], [0, 0, 1, 1], [], []>} : vector<8x8xf32>, vector<8x8xf32>, vector<8x8xf32> -> vector<8x8xf32>
    %c0_37 = arith.constant 0 : index
    %c8_38 = arith.constant 8 : index
    %45 = vector.load %arg13[%c0_37, %c8_38] : memref<8x32xf32, #tpu.memory_space<vmem>>, vector<8x8xf32>
    tpu.vector_store %arg13[%c0_37, %c8_38], %44 {strides = array<i32>} : memref<8x32xf32, #tpu.memory_space<vmem>>, vector<8x8xf32>,
    %c0_39 = arith.constant 0 : index
    %c16 = arith.constant 16 : index
    %46 = vector.load %arg12[%c0_39, %c16] : memref<8x32xf32, #tpu.memory_space<vmem>>, vector<8x8xf32>
    %c0_40 = arith.constant 0 : index
    %c16_41 = arith.constant 16 : index
    %47 = vector.load %arg11[%c0_40, %c16_41] : memref<8x64xf32, #tpu.memory_space<vmem>>, vector<8x8xf32>
    %c0_42 = arith.constant 0 : index
    %c48 = arith.constant 48 : index
    %48 = vector.load %arg11[%c0_42, %c48] : memref<8x64xf32, #tpu.memory_space<vmem>>, vector<8x8xf32>
    %cst_43 = arith.constant dense<0.000000e+00> : vector<8x8xf32>
    %49 = tpu.matmul %46, %47, %cst_43 {dimension_numbers = #tpu.dot_dimension_numbers<[1], [1], [0], [0], [0, 0, 1, 0], [], []>} : vector<8x8xf32>, vector<8x8xf32>, vector<8x8xf32> -> vector<8x8xf32>
    %cst_44 = arith.constant dense<0xFF800000> : vector<8xf32>
    %50 = vector.multi_reduction <maximumf>, %49, %cst_44 [1] : vector<8x8xf32> to vector<8xf32>
    %51 = vector.shape_cast %50 : vector<8xf32> to vector<8x1xf32>
    %52 = vector.broadcast %51 : vector<8x1xf32> to vector<8x8xf32>
    %53 = arith.subf %49, %52 : vector<8x8xf32>
    %54 = math.exp %53 : vector<8x8xf32>
    %cst_45 = arith.constant dense<0.000000e+00> : vector<8xf32>
    %55 = vector.multi_reduction <add>, %54, %cst_45 [1] : vector<8x8xf32> to vector<8xf32>
    %56 = vector.shape_cast %55 : vector<8xf32> to vector<8x1xf32>
    %57 = tpu.reciprocal %56 : vector<8x1xf32> -> vector<8x1xf32>
    %58 = vector.broadcast %57 : vector<8x1xf32> to vector<8x8xf32>
    %59 = arith.mulf %54, %58 : vector<8x8xf32>
    %c0_46 = arith.constant 0 : index
    %c2 = arith.constant 2 : index
    %c0_47 = arith.constant 0 : index
    %c0_48 = arith.constant 0 : index
    %60 = vector.load %arg10[%c0_46, %c2, %c0_47, %c0_48] : memref<1x4x8x8xf32, #tpu.memory_space<vmem>>, vector<1x1x8x8xf32>
    %61 = vector.shape_cast %60 : vector<1x1x8x8xf32> to vector<8x8xf32>
    %62 = vector.shape_cast %59 : vector<8x8xf32> to vector<1x1x8x8xf32>
    tpu.vector_store %arg10[%c0_46, %c2, %c0_47, %c0_48], %62 {strides = array<i32>} : memref<1x4x8x8xf32, #tpu.memory_space<vmem>>, vector<1x1x8x8xf32>,
    %cst_49 = arith.constant dense<0.000000e+00> : vector<8x8xf32>
    %63 = tpu.matmul %59, %48, %cst_49 {dimension_numbers = #tpu.dot_dimension_numbers<[1], [0], [0], [1], [0, 0, 1, 1], [], []>} : vector<8x8xf32>, vector<8x8xf32>, vector<8x8xf32> -> vector<8x8xf32>
    %c0_50 = arith.constant 0 : index
    %c16_51 = arith.constant 16 : index
    %64 = vector.load %arg13[%c0_50, %c16_51] : memref<8x32xf32, #tpu.memory_space<vmem>>, vector<8x8xf32>
    tpu.vector_store %arg13[%c0_50, %c16_51], %63 {strides = array<i32>} : memref<8x32xf32, #tpu.memory_space<vmem>>, vector<8x8xf32>,
    %c0_52 = arith.constant 0 : index
    %c24 = arith.constant 24 : index
    %65 = vector.load %arg12[%c0_52, %c24] : memref<8x32xf32, #tpu.memory_space<vmem>>, vector<8x8xf32>
    %c0_53 = arith.constant 0 : index
    %c24_54 = arith.constant 24 : index
    %66 = vector.load %arg11[%c0_53, %c24_54] : memref<8x64xf32, #tpu.memory_space<vmem>>, vector<8x8xf32>
    %c0_55 = arith.constant 0 : index
    %c56 = arith.constant 56 : index
    %67 = vector.load %arg11[%c0_55, %c56] : memref<8x64xf32, #tpu.memory_space<vmem>>, vector<8x8xf32>
    %cst_56 = arith.constant dense<0.000000e+00> : vector<8x8xf32>
    %68 = tpu.matmul %65, %66, %cst_56 {dimension_numbers = #tpu.dot_dimension_numbers<[1], [1], [0], [0], [0, 0, 1, 0], [], []>} : vector<8x8xf32>, vector<8x8xf32>, vector<8x8xf32> -> vector<8x8xf32>
    %cst_57 = arith.constant dense<0xFF800000> : vector<8xf32>
    %69 = vector.multi_reduction <maximumf>, %68, %cst_57 [1] : vector<8x8xf32> to vector<8xf32>
    %70 = vector.shape_cast %69 : vector<8xf32> to vector<8x1xf32>
    %71 = vector.broadcast %70 : vector<8x1xf32> to vector<8x8xf32>
    %72 = arith.subf %68, %71 : vector<8x8xf32>
    %73 = math.exp %72 : vector<8x8xf32>
    %cst_58 = arith.constant dense<0.000000e+00> : vector<8xf32>
    %74 = vector.multi_reduction <add>, %73, %cst_58 [1] : vector<8x8xf32> to vector<8xf32>
    %75 = vector.shape_cast %74 : vector<8xf32> to vector<8x1xf32>
    %76 = tpu.reciprocal %75 : vector<8x1xf32> -> vector<8x1xf32>
    %77 = vector.broadcast %76 : vector<8x1xf32> to vector<8x8xf32>
    %78 = arith.mulf %73, %77 : vector<8x8xf32>
    %c0_59 = arith.constant 0 : index
    %c3 = arith.constant 3 : index
    %c0_60 = arith.constant 0 : index
    %c0_61 = arith.constant 0 : index
    %79 = vector.load %arg10[%c0_59, %c3, %c0_60, %c0_61] : memref<1x4x8x8xf32, #tpu.memory_space<vmem>>, vector<1x1x8x8xf32>
    %80 = vector.shape_cast %79 : vector<1x1x8x8xf32> to vector<8x8xf32>
    %81 = vector.shape_cast %78 : vector<8x8xf32> to vector<1x1x8x8xf32>
    tpu.vector_store %arg10[%c0_59, %c3, %c0_60, %c0_61], %81 {strides = array<i32>} : memref<1x4x8x8xf32, #tpu.memory_space<vmem>>, vector<1x1x8x8xf32>,
    %cst_62 = arith.constant dense<0.000000e+00> : vector<8x8xf32>
    %82 = tpu.matmul %78, %67, %cst_62 {dimension_numbers = #tpu.dot_dimension_numbers<[1], [0], [0], [1], [0, 0, 1, 1], [], []>} : vector<8x8xf32>, vector<8x8xf32>, vector<8x8xf32> -> vector<8x8xf32>
    %c0_63 = arith.constant 0 : index
    %c24_64 = arith.constant 24 : index
    %83 = vector.load %arg13[%c0_63, %c24_64] : memref<8x32xf32, #tpu.memory_space<vmem>>, vector<8x8xf32>
    tpu.vector_store %arg13[%c0_63, %c24_64], %82 {strides = array<i32>} : memref<8x32xf32, #tpu.memory_space<vmem>>, vector<8x8xf32>,
    %c0_65 = arith.constant 0 : index
    %c0_66 = arith.constant 0 : index
    %84 = vector.load %arg13[%c0_65, %c0_66] : memref<8x32xf32, #tpu.memory_space<vmem>>, vector<8x32xf32>
    %c0_67 = arith.constant 0 : index
    %c0_68 = arith.constant 0 : index
    %85 = vector.load %arg7[%c0_67, %c0_68] : memref<32x32xf32, #tpu.memory_space<vmem>>, vector<32x32xf32>
    %cst_69 = arith.constant dense<0.000000e+00> : vector<8x32xf32>
    %86 = tpu.matmul %84, %85, %cst_69 {dimension_numbers = #tpu.dot_dimension_numbers<[1], [0], [0], [1], [0, 0, 1, 1], [], []>} : vector<8x32xf32>, vector<32x32xf32>, vector<8x32xf32> -> vector<8x32xf32>
    %c0_70 = arith.constant 0 : index
    %c0_71 = arith.constant 0 : index
    %87 = vector.load %arg8[%c0_70, %c0_71] : memref<1x32xf32, #tpu.memory_space<vmem>>, vector<1x32xf32>
    %88 = vector.broadcast %87 : vector<1x32xf32> to vector<8x32xf32>
    %89 = arith.addf %86, %88 : vector<8x32xf32>
    %c0_72 = arith.constant 0 : index
    %c0_73 = arith.constant 0 : index
    %c0_74 = arith.constant 0 : index
    %90 = vector.load %arg9[%c0_72, %c0_73, %c0_74] : memref<1x8x32xf32, #tpu.memory_space<vmem>>, vector<1x8x32xf32>
    %91 = vector.shape_cast %90 : vector<1x8x32xf32> to vector<8x32xf32>
    %92 = vector.shape_cast %89 : vector<8x32xf32> to vector<1x8x32xf32>
    tpu.vector_store %arg9[%c0_72, %c0_73, %c0_74], %92 {strides = array<i32>} : memref<1x8x32xf32, #tpu.memory_space<vmem>>, vector<1x8x32xf32>,
    return
  }
  func.func @transform_0(%arg0: i32, %arg1: i32, %arg2: memref<4xi32, #tpu.memory_space<smem>>, %arg3: memref<1xi32, #tpu.memory_space<smem>>) -> (i32, i32, i32) {
    %c0_i32 = arith.constant 0 : i32
    %c0_i32_0 = arith.constant 0 : i32
    %c0_i32_1 = arith.constant 0 : i32
    return %arg0, %c0_i32, %c0_i32_0 : i32, i32, i32
  }
  func.func @transform_1(%arg0: i32, %arg1: i32, %arg2: memref<4xi32, #tpu.memory_space<smem>>, %arg3: memref<1xi32, #tpu.memory_space<smem>>) -> (i32, i32) {
    %c0_i32 = arith.constant 0 : i32
    %c0_i32_0 = arith.constant 0 : i32
    %c0_i32_1 = arith.constant 0 : i32
    return %c0_i32, %c0_i32_0 : i32, i32
  }
  func.func @transform_2(%arg0: i32, %arg1: i32, %arg2: memref<4xi32, #tpu.memory_space<smem>>, %arg3: memref<1xi32, #tpu.memory_space<smem>>) -> (i32, i32) {
    %c0_i32 = arith.constant 0 : i32
    %c0_i32_0 = arith.constant 0 : i32
    %c0_i32_1 = arith.constant 0 : i32
    return %c0_i32, %c0_i32_0 : i32, i32
  }
  func.func @transform_3(%arg0: i32, %arg1: i32, %arg2: memref<4xi32, #tpu.memory_space<smem>>, %arg3: memref<1xi32, #tpu.memory_space<smem>>) -> (i32, i32) {
    %c0_i32 = arith.constant 0 : i32
    %c0_i32_0 = arith.constant 0 : i32
    %c0_i32_1 = arith.constant 0 : i32
    return %c0_i32, %c0_i32_0 : i32, i32
  }
  func.func @transform_4(%arg0: i32, %arg1: i32, %arg2: memref<4xi32, #tpu.memory_space<smem>>, %arg3: memref<1xi32, #tpu.memory_space<smem>>) -> (i32, i32) {
    %c0_i32 = arith.constant 0 : i32
    %c0_i32_0 = arith.constant 0 : i32
    %c0_i32_1 = arith.constant 0 : i32
    return %c0_i32, %c0_i32_0 : i32, i32
  }
  func.func @transform_5(%arg0: i32, %arg1: i32, %arg2: memref<4xi32, #tpu.memory_space<smem>>, %arg3: memref<1xi32, #tpu.memory_space<smem>>) -> (i32, i32, i32) {
    %c0_i32 = arith.constant 0 : i32
    %c0_i32_0 = arith.constant 0 : i32
    return %arg0, %arg1, %c0_i32 : i32, i32, i32
  }
  func.func @transform_6(%arg0: i32, %arg1: i32, %arg2: memref<4xi32, #tpu.memory_space<smem>>, %arg3: memref<1xi32, #tpu.memory_space<smem>>) -> (i32, i32, i32, i32) {
    %c0_i32 = arith.constant 0 : i32
    %c0_i32_0 = arith.constant 0 : i32
    %c0_i32_1 = arith.constant 0 : i32
    return %arg0, %c0_i32, %arg1, %c0_i32_0 : i32, i32, i32, i32
  }
}

</mosaic_0001>

<bundles_post_ra>
// kernel: tpu_custom_call.1
= control target key start
LH: loop header
LB: loop body
LE: loop exit
PB: predicated region body
PF: predicated region fallthrough
CT: control target
= control target key end

     0   :  { %s2379_s0 = inlined_call_operand.vmem [shape: s32[4], index: 0, kind: input, shape index: {}]   ;;  %s2380_s1 = inlined_call_operand.<no memory space> [shape: s32[1], index: 1, kind: input, shape index: {}]   ;;  %s2381_s2 = inlined_call_operand.hbm [shape: f32[2,8,32], index: 2, kind: input, shape index: {}]   ;;  %s2382_s3 = inlined_call_operand.hbm [shape: f32[32,32], index: 3, kind: input, shape index: {}]   ;;  %s2383_s4 = inlined_call_operand.hbm [shape: f32[32,64], index: 4, kind: input, shape index: {}]   ;;  %s2384_s5 = inlined_call_operand.hbm [shape: f32[32,32], index: 5, kind: input, shape index: {}]   ;;  %s2385_s6 = inlined_call_operand.vmem [shape: f32[1,32], index: 6, kind: input, shape index: {}]   ;;  %s2386_s7 = inlined_call_operand.hbm [shape: f32[2,8,32], index: 7, kind: output, shape index: {0}]   ;;  %s2387_s8 = inlined_call_operand.hbm [shape: f32[2,4,8,8], index: 8, kind: output, shape index: {1}]  }
   0x1   :  { %2392 = sst [smem:[#allocation25_spill]] %s2382_s3  ;;  %s14_s28 = sshll.u32 %s2379_s0, 4  ;;  %s15_s28 = int_to_ptr.vmem [resolvable:$true] %s14_s28 }
   0x2   :  { %2393 = sst [smem:[#allocation26_spill]] %s2383_s4  ;;  %s1744_s29 = scalar_lea.vmem %s15_s28, 16 }
   0x3   :  { %p1745_p0 = scmp.ne.s32.totalorder %s15_s28, %s1744_s29  ;;  %p1749_p1 = scmp.lt.s32.totalorder %s15_s28, %s15_s28 }
   0x4   :  { %p1750_p2 = scmp.lt.s32.totalorder %s1744_s29, %s1744_s29 }
   0x6   :  { %p1751_p3 = por %p1750_p2, %p1749_p1 }
   0x8   :  { %p1752_p4 = pnand %p1751_p3, %p1745_p0 }
   0xa   :  { %1755 = shalt.err (!%p1752_p4)  }
   0xb   :  { %s1984_s30 = smov [#allocation6]  }
   0xc   :  { %17 = dma.vmem_to_smem %s15_s28, 16, %s1984_s30, [#allocation5] }
   0xd   :  { %1938 = dma.done.wait [#allocation5], 16 }
   0xe   :  { %1939 = vsyncadd [#allocation5], 4294967280 }
   0xf   :  { %20 = sfence }
  0x10   :  { %21 = vsyncpa [#allocation9], 0 }
  0x11   :  { %23 = vsyncpa [#allocation9 + $0x1], 0 }
  0x12   :  { %24 = vsyncpa [#allocation12], 0 }
  0x13   :  { %25 = vsyncpa [#allocation15], 0 }
  0x14   :  { %26 = vsyncpa [#allocation10], 0 }
  0x15   :  { %28 = vsyncpa [#allocation10 + $0x1], 0 }
  0x16   :  { %29 = vsyncpa [#allocation18], 0 }
  0x17   :  { %31 = vsyncpa [#allocation18 + $0x1], 0  ;;  %s2054_s0 = smov 0   ;;  %s2056_s9 = smov 0  }
  0x18   :  { %s2058_s10 = smov 0   ;;  %s2060_s11 = smov 0  }
  0x19   :  { %s2062_s12 = smov 0   ;;  %s2064_s13 = smov 0  }
  0x1a LB: > { %s1467_s14 = sadd.s32 4294967295, %s1982_s13   ;;  %s1468_s15 = sadd.s32 4294967294, %s1982_s13   ;;  %s1982_s13 = sphi %s2064_s13, %s37_s13   ;;  %s1978_s12 = sphi %s2062_s12, %s2413_s12   ;;  %s1974_s11 = sphi %s2060_s11, %s2412_s11   ;;  %s1970_s10 = sphi %s2058_s10, %s2411_s10   ;;  %s1966_s9 = sphi %s2056_s9, %s2410_s9   ;;  %s1962_s0 = sphi %s2054_s0, %s2409_s0  }
  0x1b   : > { %p69_p5 = scmp.ne.s32.totalorder %s1966_s9, %s1962_s0  ;;  %p2088_p6 = scmp.eq.s32.totalorder %s1467_s14, 0 }
  0x1c   : > { %p2092_p7 = scmp.eq.s32.totalorder %s1467_s14, 1  ;;  %p185_p8 = scmp.eq.s32.totalorder %s1468_s15, 1 }
  0x1d   : > { %s2394_s16 = scalar_select %p2088_p6, 1, 0 }
  0x1e   : > { %p2098_p9 = por %p2088_p6, %p69_p5  ;;  %p1469_p10 = scmp.ge.s32.totalorder %s1982_s13, 1 }
  0x1f   : > { %p2103_p11 = por %p185_p8, %p69_p5  ;;  %p220_p12 = scmp.lt.s32.totalorder %s1982_s13, 3 }
  0x20   : > { %s2396_s18 = scalar_select %p2098_p9, 1, 0 }
  0x21   : > { %s2397_s19 = scalar_select %p2103_p11, 1, 0 }
  0x22   : > { %p2108_p13 = pnand %p1469_p10, %p220_p12  ;;  %s1985_s21 = smov [#allocation11]  }
  0x23   : > { %s232_s22 = sshll.u32 %s1985_s21, 4  ;;  %s1986_s24 = smov [#allocation13]   ;;  %s233_s22 = int_to_ptr.vmem [resolvable:$true] %s232_s22 }
  0x24   : > { %s2398_s20 = scalar_select %p2108_p13, 1, 0 }
  0x25   : > { %p1632_p0 = pneg %p2108_p13  ;;  %s245_s25 = sshll.u32 %s1986_s24, 4  ;;  %s246_s25 = int_to_ptr.vmem [resolvable:$true] %s245_s25 }
  0x26   : > { %s1987_s1 = smov [#allocation14]   ;;  %s1767_s27 = scalar_lea.vmem %s233_s22, 512 }
  0x27   : > { %p2117_p2 = pnand %p1632_p0, %p2088_p6  ;;  %s258_s26 = sshll.u32 %s1987_s1, 4  ;;  %s259_s26 = int_to_ptr.vmem [resolvable:$true] %s258_s26 }
  0x28   : > { %p1768_p4 = scmp.ne.s32.totalorder %s233_s22, %s1767_s27  ;;  %p1775_p10 = scmp.lt.s32.totalorder %s233_s22, %s233_s22 }
  0x29   : > { %p1758_p3 = pneg %p2117_p2  ;;  %p1776_p12 = scmp.lt.s32.totalorder %s1767_s27, %s1767_s27 }
  0x2b   : > { %p1770_p5 = pnand %p1768_p4, %p1758_p3  ;;  %p1777_p0 = por %p1776_p12, %p1775_p10 }
  0x2d   : > { %p1771_p8 = pneg %p1770_p5 }
  0x2f   : > { %p1778_p1 = pnand %p1777_p0, %p1771_p8 }
  0x31   : > { %1781 = shalt.err (!%p1778_p1)
}
  0x32   : > { %s1988_s28 = smov 128   ;;  %s1989_s29 = smov 8  }
  0x33   : > { %s2400_s3 = sld [smem:[#allocation25_spill]]  ;;  %s1793_s15 = scalar_lea.vmem %s246_s25, 512 }
  0x34   : > { %p1794_p11 = scmp.ne.s32.totalorder %s246_s25, %s1793_s15  ;;  %p1801_p6 = scmp.lt.s32.totalorder %s246_s25, %s246_s25 }
  0x35   : > { %p1802_p9 = scmp.lt.s32.totalorder %s1793_s15, %s1793_s15 }
  0x36   : > { %p1796_p4 = pnand %p1794_p11, %p1758_p3 }
  0x37   : > { %p1803_p10 = por %p1802_p9, %p1801_p6 }
  0x38   : > { %p1797_p5 = pneg %p1796_p4 }
  0x39   : > { %1635 = dma.hbm_to_vmem [thread:$0]  (!%p2117_p2), %s2400_s3, 512, %s233_s22, [#allocation12], %s1988_s28, %s1988_s28, %s1989_s29  }
  0x3a   : > { %p1804_p8 = pnand %p1803_p10, %p1797_p5 }
  0x3c   : > { %1807 = shalt.err (!%p1804_p8)
}
  0x3d   : > { %s2401_s4 = sld [smem:[#allocation26_spill]]  ;;  %s1819_s22 = scalar_lea.vmem %s259_s26, 512 }
  0x3e   : > { %p1820_p1 = scmp.ne.s32.totalorder %s259_s26, %s1819_s22  ;;  %p1827_p0 = scmp.lt.s32.totalorder %s259_s26, %s259_s26 }
  0x3f   : > { %p1828_p4 = scmp.lt.s32.totalorder %s1819_s22, %s1819_s22 }
  0x40   : > { %p1822_p12 = pnand %p1820_p1, %p1758_p3 }
  0x41   : > { %p1829_p13 = por %p1828_p4, %p1827_p0 }
  0x42   : > { %p1823_p11 = pneg %p1822_p12 }
  0x43   : > { %1638 = dma.hbm_to_vmem [thread:$0]  (!%p2117_p2), %s2401_s4, 512, %s246_s25, [#allocation12], %s1988_s28, %s1988_s28, %s1989_s29  }
  0x44   : > { %p1830_p6 = pnand %p1829_p13, %p1823_p11 }
  0x46   : > { %1833 = shalt.err (!%p1830_p6)
}
  0x47   : > { %1641 = dma.hbm_to_vmem [thread:$0]  (!%p2117_p2), %s2384_s5, 512, %s259_s26, [#allocation15], %s1988_s28, %s1988_s28, %s1989_s29  }
  0x48   : > { %s56_s25 = sadd.s32 1, %s1970_s10  ;;  %s49_s30 = sadd.s32 1, %s1978_s12 }
  0x49   : > { %p63_p9 = scmp.ne.s32.totalorder %s1970_s10, %s1966_s9  ;;  %p51_p13 = scmp.ge.s32.totalorder %s49_s30, 2 }
  0x4a   : > { %p64_p3 = scmp.eq.s32.totalorder %s1982_s13, 0  ;;  %p1656_p10 = scmp.lt.s32.totalorder %s1982_s13, 2 }
  0x4b   : > { %p2154_p5 = por %p2092_p7, %p63_p9  ;;  %s2415_s30 = smov (%p51_p13, %s49_s30), 0 }
  0x4c   : > { %p65_p8 = por %p64_p3, %p63_p9  ;;  %s275_s14 = sand.u32 1, %s1970_s10  }
  0x4d   : > { %s53_s15 = ssub.s32 %s1978_s12, %s2415_s30  ;;  %s1474_s26 = sshll.u32 %s275_s14, 3 }
  0x4e   : > { %p54_p1 = scmp.eq.s32.totalorder %s53_s15, 0  ;;  %s1475_s28 = sshll.u32 %s1978_s12, 7 }
  0x4f   : > { %s284_s17 = scalar_lea.hbm %s2381_s2, %s1475_s28  ;;  %s279_s22 = scalar_lea.vmem [#allocation8], %s1474_s26 }
  0x50   : > { %s2166_s29 = scalar_select %p54_p1, %s1970_s10, %s56_s25  }
  0x51   : > { %s286_s1 = sshll.u32 %s279_s22, 4  ;;  %p2173_p7 = pnand %p1656_p10, %p65_p8  ;;  %s287_s1 = int_to_ptr.vmem [resolvable:$true] %s286_s1 }
  0x52   : > { %s276_s3 = scalar_lea.sflag [#allocation9], %s275_s14  ;;  %s1847_s15 = scalar_lea.vmem %s287_s1, 128 }
  0x53   : > { %p1836_p2 = pneg %p2173_p7  ;;  %p1848_p12 = scmp.ne.s32.totalorder %s287_s1, %s1847_s15 }
  0x54   : > { %s1990_s25 = smov [#allocation8]  }
  0x55   : > { %p1850_p11 = pnand %p1848_p12, %p1836_p2  ;;  %s1852_s4 = sshll.u32 %s1990_s25, 4  ;;  %s1853_s4 = int_to_ptr.vmem [resolvable:$false] %s1852_s4 }
  0x56   : > { %s1854_s28 = scalar_lea.vmem %s1853_s4, 256  ;;  %p1855_p4 = scmp.lt.s32.totalorder %s287_s1, %s1853_s4 }
  0x57   : > { %p1851_p0 = pneg %p1850_p11  ;;  %p1856_p6 = scmp.lt.s32.totalorder %s1854_s28, %s1847_s15 }
  0x59   : > { %p1857_p9 = por %p1856_p6, %p1855_p4 }
  0x5b   : > { %p1858_p13 = pnand %p1857_p9, %p1851_p0 }
  0x5d   : > { %1861 = shalt.err (!%p1858_p13)
}
  0x5e   : > { %1645 = dma.hbm_to_vmem [thread:$0]  (!%p2173_p7), %s284_s17, 128, %s287_s1, %s276_s3  }
  0x5f   : > { %p2404_p3 = scmp.ne.s32.totalorder %s2398_s20, 0 }
  0x60   : > { %s2184_s14 = sand.u32 (!%p2404_p3), 1, %s1966_s9   ;;  %p2405_p10 = scmp.ne.s32.totalorder (!%p2404_p3), %s2396_s18, 0 }
  0x61   : > { %295 = sbr.rel (%p2404_p3) target bundleno = 1476 (0x5c4), region = 40  ;;  %s1477_s26 = sshll.u32 (!%p2404_p3), %s2184_s14, 3 }
  0x62   : > { %s298_s21 = scalar_lea.sflag (!%p2404_p3), [#allocation9], %s2184_s14  ;;  %s2190_s4 = scalar_lea.vmem (!%p2404_p3), [#allocation8], %s1477_s26 }
  0x66   : > { %1941 = dma.done.wait (%p2405_p10), %s298_s21, 128  }
  0x67   : > { %1943 = vsyncadd (%p2405_p10), %s298_s21, 4294967168  ;;  %p2406_p8 = scmp.ne.s32.totalorder %s2394_s16, 0 }
  0x69   : > { %1945 = dma.done.wait (%p2406_p8), [#allocation12], 1024  }
  0x6a   : > { %1947 = vsyncadd (%p2406_p8), [#allocation12], 4294966272 }
  0x6b   : > { %1949 = dma.done.wait (%p2406_p8), [#allocation15], 512  }
  0x6c   : > { %1951 = vsyncadd (%p2406_p8), [#allocation15], 4294966784  ;;  %v1991_v0 = vmov 0.0   ;;  %vm1992_vm0 = vmmov 0   ;;  %v351_v1 = vld [vmem:[#allocation13 + $0x18] sm:$0xff]  ;;  %v350_v2 = vld [vmem:[#allocation13 + $0x10] sm:$0xff] }
  0x6d   : > { %1541 = vmatprep.subr.mxu0 %v1991_v0  ;;  %1552 = vmatprep.subr.mxu1 %v1991_v0  ;;  %v431_v3 = vld [vmem:[#allocation11 + $0x18] sm:$0xff]  ;;  %v430_v4 = vld [vmem:[#allocation11 + $0x10] sm:$0xff]  ;;  %v349_v5 = vld [vmem:[#allocation13 + $0x8] sm:$0xff]  ;;  %vm352_vm1 = vcmask 261120   ;;  %vm426_vm2 = vcmask 523264   ;;  %vm505_vm3 = vcmask 64512  }
  0x6e   : > { %1549 = vmatprep.mubr.msk.f32.mxu0 %vm1992_vm0, %v1991_v0  ;;  %1560 = vmatprep.mubr.msk.f32.mxu1 %vm1992_vm0, %v1991_v0  ;;  %v429_v6 = vld [vmem:[#allocation11 + $0x8] sm:$0xff]  ;;  %v348_v7 = vld [vmem:[#allocation13] sm:$0xff]  ;;  %v347_v9 = vld [vmem:[%s2190_s4] sm:$0xff]  ;;  %s1993_s3 = smov 112   ;;  %s1994_s16 = smov 120   ;;  %vm846_vm4 = vcmask 130112  }
  0x6f   : > { %1542 = vmatpush3.msra.mxu0 %v351_v1  ;;  %1553 = vmatpush3.msra.mxu1 %v431_v3  ;;  %v428_v8 = vld [vmem:[#allocation11] sm:$0xff]  ;;  %s1995_s18 = smov 104   ;;  %s1996_s20 = smov 96   ;;  %vm1023_vm5 = vcmask 195712   ;;  %vm1200_vm6 = vcmask 261312  }
  0x70   : > { %1543 = vmatprep.subr.mxu0 %v1991_v0  ;;  %1554 = vmatprep.subr.mxu1 %v1991_v0  ;;  %s1997_s24 = smov 80   ;;  %s1998_s17 = smov 72  }
  0x71   : > { %1544 = vmatpush3.msra.mxu0 %v350_v2  ;;  %1555 = vmatpush3.msra.mxu1 %v430_v4  ;;  %s1999_s22 = smov 88   ;;  %s1482_s1 = sshll.u32 %s2184_s14, 5 }
  0x72   : > { %1545 = vmatprep.subr.mxu0 %v1991_v0  ;;  %1556 = vmatprep.subr.mxu1 %v1991_v0  ;;  %s2266_s27 = scalar_lea.vmem [#allocation17], %s1482_s1  ;;  %s2000_s15 = smov 8  }
  0x73   : > { %1546 = vmatpush3.msra.mxu0 %v349_v5  ;;  %1557 = vmatpush3.msra.mxu1 %v429_v6  ;;  %s2001_s25 = smov 16   ;;  %s2002_s28 = smov 24  }
  0x74   : > { %1547 = vmatprep.subr.mxu0 %v1991_v0  ;;  %1558 = vmatprep.subr.mxu1 %v1991_v0  ;;  %s1509_s21 = sshll.u32 %s1974_s11, 9  ;;  %s1322_s4 = sshll.u32 %s2266_s27, 4  ;;  %s2301_s4 = int_to_ptr.vmem [resolvable:$true] %s1322_s4 }
  0x75   : > { %1548 = vmatpush3.msra.mxu0 %v348_v7  ;;  %1559 = vmatpush3.msra.mxu1 %v428_v8 }
  0x76   : > { %1550 = vmatmul.mubr.msk.f32.vlgmr.msra.gmra.mxu0 %vm352_vm1, %v347_v9  ;;  %1561 = vmatmul.mubr.msk.f32.vlgmr.msra.gmra.mxu1 %vm352_vm1, %v347_v9  ;;  %v1206_v9 = vld [vmem:[#allocation14 + $0x18] sm:$0xff] }
  0x77   : > { %1563 = vmatprep.subr.mxu1 %v1991_v0  ;;  %1565 = vmatprep.mubr.msk.f32.mxu1 %vm1992_vm0, %v1991_v0 }
  0x78   : > { %1573 = vmatprep.subr.mxu0 %v1991_v0  ;;  %1575 = vmatprep.mubr.msk.f32.mxu0 %vm1992_vm0, %v1991_v0 }
 0x136   : > { %v422_v10 = vpop.f32.mrf.mxu0  ;;  %v498_v11 = vpop.f32.mrf.mxu1 }
 0x137   : > { %427 = vst.msk [vmem:[#allocation2] sm:$0xff] %vm426_vm2, %v422_v10  ;;  %v1205_v10 = vld [vmem:[#allocation14 + $0x10] sm:$0xff] }
 0x138   : > { %502 = vst.msk [vmem:[#allocation3] sm:$0xff] %vm352_vm1, %v498_v11  ;;  %v1551_v12 = vpop.f32.mrf.mxu0  ;;  %v1562_v13 = vpop.f32.mrf.mxu1  ;;  %v1204_v11 = vld [vmem:[#allocation14 + $0x8] sm:$0xff] }
 0x139   : > { %v1203_v13 = vld [vmem:[#allocation14] sm:$0xff] }
 0x13e   : > { %v2226_v14 = vld [vmem:[#allocation2] sm:$0xff] }
 0x13f   : > { %854 = vrot.lane.b32.xlu1 %v2226_v14, %s1993_s3  ;;  %677 = vrot.lane.b32.xlu0 %v2226_v14, %s1994_s16  ;;  %v503_v15 = vld [vmem:[#allocation3] sm:$0xff] }
 0x140   : > { %1564 = vmatpush3.xpose.msk.msra.mxu1 %vm505_vm3, %v2226_v14 }
 0x141   : > { %1568 = vmatprep.subr.mxu1 %v1991_v0 }
 0x143   : > { %1566 = vmatmul.mubr.msk.f32.vlgmr.msra.gmra.mxu1 %vm505_vm3, %v503_v15  ;;  %851 = vrot.lane.b32.xlu1 %v503_v15, %s1993_s3 }
 0x144   : > { %674 = vrot.lane.b32.xlu0 %v503_v15, %s1994_s16  ;;  %1570 = vmatprep.mubr.msk.f32.mxu1 %vm1992_vm0, %v1991_v0 }
 0x147   : > { %1028 = vrot.lane.b32.xlu1 %v503_v15, %s1995_s18 }
 0x148   : > { %1031 = vrot.lane.b32.xlu0 %v2226_v14, %s1995_s18  ;;  %s2299_s18 = scalar_lea.hbm %s2387_s8, %s1509_s21 }
 0x1b1   : > { %v678_v16 = vpop.permute.xlu0 %677  ;;  %v855_v17 = vpop.permute.xlu1 %854 }
 0x1b2   : > { %1574 = vmatpush3.xpose.msk.msra.mxu0 %vm505_vm3, %v678_v16 }
 0x1b3   : > { %1583 = vmatprep.subr.mxu0 %v1991_v0 }
 0x1b5   : > { %v852_v19 = vpop.permute.xlu1 %851 }
 0x1b6   : > { %v675_v18 = vpop.permute.xlu0 %674 }
 0x1b7   : > { %1576 = vmatmul.mubr.msk.f32.vlgmr.msra.gmra.mxu0 %vm505_vm3, %v675_v18 }
 0x1b8   : > { %1584 = vmatpush3.xpose.msk.msra.mxu0 %vm505_vm3, %v855_v17  ;;  %1585 = vmatprep.mubr.msk.f32.mxu0 %vm1992_vm0, %v1991_v0 }
 0x1b9   : > { %1593 = vmatprep.subr.mxu0 %v1991_v0  ;;  %v1029_v21 = vpop.permute.xlu1 %1028 }
 0x1ba   : > { %v1032_v20 = vpop.permute.xlu0 %1031 }
 0x1bb   : > { %1586 = vmatmul.mubr.msk.f32.vlgmr.msra.gmra.mxu0 %vm505_vm3, %v852_v19 }
 0x1bc   : > { %1594 = vmatpush3.xpose.msk.msra.mxu0 %vm505_vm3, %v1032_v20  ;;  %1595 = vmatprep.mubr.msk.f32.mxu0 %vm1992_vm0, %v1991_v0 }
 0x1bd   : > { %1603 = vmatprep.subr.mxu0 %v1991_v0 }
 0x1bf   : > { %1596 = vmatmul.mubr.msk.f32.vlgmr.msra.gmra.mxu0 %vm505_vm3, %v1029_v21 }
 0x1c0   : > { %1611 = vmatprep.mubr.msk.f32.mxu0 %vm1992_vm0, %v1991_v0  ;;  %1604 = vmatpush3.msra.mxu0 %v1206_v9 }
 0x1c1   : > { %1605 = vmatprep.subr.mxu0 %v1991_v0 }
 0x1c2   : > { %1606 = vmatpush3.msra.mxu0 %v1205_v10 }
 0x1c3   : > { %1607 = vmatprep.subr.mxu0 %v1991_v0 }
 0x1c4   : > { %1608 = vmatpush3.msra.mxu0 %v1204_v11 }
 0x1c5   : > { %1609 = vmatprep.subr.mxu0 %v1991_v0 }
 0x1c6   : > { %1610 = vmatpush3.msra.mxu0 %v1203_v13 }
 0x203   : > { %v578_v22 = vpop.f32.mrf.mxu1 }
 0x204   : > { %v582_v23 = vsel %vm505_vm3, %v578_v22, -inf }
 0x205   : > { %583 = vmax.xlane.f32.xlu0 %v582_v23  ;;  %v1567_v24 = vpop.f32.mrf.mxu1 }
 0x277   : > { %v749_v25 = vpop.f32.mrf.mxu0 }
 0x278   : > { %v753_v26 = vsel %vm505_vm3, %v749_v25, -inf }
 0x279   : > { %754 = vmax.xlane.f32.xlu1 %v753_v26  ;;  %v1577_v27 = vpop.f32.mrf.mxu0 }
 0x27b   : > { %v926_v28 = vpop.f32.mrf.mxu0 }
 0x27c   : > { %v930_v29 = vsel %vm505_vm3, %v926_v28, -inf }
 0x27d   : > { %931 = vmax.xlane.f32.xlu0 %v930_v29  ;;  %v1587_v30 = vpop.f32.mrf.mxu0 }
 0x27f   : > { %v1103_v31 = vpop.f32.mrf.mxu0 }
 0x280   : > { %v1107_v32 = vsel %vm505_vm3, %v1103_v31, -inf }
 0x281   : > { %1108 = vmax.xlane.f32.xlu0 %v1107_v32  ;;  %v1597_v33 = vpop.f32.mrf.mxu0 }
 0x28a   : > { %594 = vrot.lane.b32.xlu1 %v2226_v14, %s1996_s20  ;;  %s1294_s20 = scalar_lea.sflag [#allocation18], %s2184_s14 }
 0x28e   : > { %v584_v34 = vpop.xlane.xlu0 %583 }
 0x28f   : > { %v585_v35 = vsub.f32 %v578_v22, %v584_v34 }
 0x291   : > { %v586_v36 = vmul.f32 1.442695, %v585_v35 }
 0x293   : > { %1728 = vpow2.f32 %v586_v36 }
 0x2a0   : > { %v1729_v37 = vpop.eup %1728 }
 0x2a1   : > { %v588_v38 = vsel %vm505_vm3, %v1729_v37, 0.0 }
 0x2ae   : > { %589 = vadd.xlane.f32.xlu1 %v588_v38 }
 0x302   : > { %v755_v39 = vpop.xlane.xlu1 %754 }
 0x303   : > { %v756_v40 = vsub.f32 %v749_v25, %v755_v39 }
 0x305   : > { %v757_v41 = vmul.f32 1.442695, %v756_v40 }
 0x306   : > { %v595_v42 = vpop.permute.xlu1 %594  ;;  %v932_v43 = vpop.xlane.xlu0 %931 }
 0x307   : > { %1730 = vpow2.f32 %v757_v41  ;;  %v933_v44 = vsub.f32 %v926_v28, %v932_v43  ;;  %1569 = vmatpush3.msra.mxu1 %v595_v42 }
 0x308   : > { %1578 = vmatprep.subr.mxu1 %v1991_v0 }
 0x309   : > { %v934_v45 = vmul.f32 1.442695, %v933_v44 }
 0x30a   : > { %v1109_v46 = vpop.xlane.xlu0 %1108 }
 0x30b   : > { %1732 = vpow2.f32 %v934_v45  ;;  %v1110_v47 = vsub.f32 %v1103_v31, %v1109_v46 }
 0x30d   : > { %v1111_v48 = vmul.f32 1.442695, %v1110_v47 }
 0x30f   : > { %1734 = vpow2.f32 %v1111_v48 }
 0x314   : > { %v1731_v49 = vpop.eup %1730 }
 0x315   : > { %v759_v50 = vsel %vm505_vm3, %v1731_v49, 0.0 }
 0x316   : > { %760 = vadd.xlane.f32.xlu0 %v759_v50 }
 0x318   : > { %v1733_v51 = vpop.eup %1732 }
 0x319   : > { %v936_v52 = vsel %vm505_vm3, %v1733_v51, 0.0 }
 0x31a   : > { %937 = vadd.xlane.f32.xlu1 %v936_v52 }
 0x31c   : > { %v1735_v53 = vpop.eup %1734 }
 0x31d   : > { %v1113_v54 = vsel %vm505_vm3, %v1735_v53, 0.0 }
 0x31e   : > { %1114 = vadd.xlane.f32.xlu0 %v1113_v54 }
 0x32b   : > { %943 = vrot.lane.b32.xlu1 %v2226_v14, %s1997_s24  ;;  %s1862_s24 = scalar_lea.vmem %s2301_s4, 512 }
 0x32c   : > { %p1863_p1 = scmp.ne.s32.totalorder %s2301_s4, %s1862_s24 }
 0x32e   : > { %p1864_p7 = pnand %p1863_p1, %p2154_p5 }
 0x32f   : > { %1120 = vrot.lane.b32.xlu1 %v2226_v14, %s1998_s17  ;;  %s2003_s17 = smov [#allocation17]  }
 0x330   : > { %p1865_p2 = pneg %p1864_p7 }
 0x334   : > { %766 = vrot.lane.b32.xlu0 %v2226_v14, %s1999_s22  ;;  %s1866_s22 = sshll.u32 %s2003_s17, 4  ;;  %s1867_s22 = int_to_ptr.vmem [resolvable:$false] %s1866_s22 }
 0x335   : > { %s1868_s1 = scalar_lea.vmem %s1867_s22, 1024  ;;  %p1869_p12 = scmp.lt.s32.totalorder %s2301_s4, %s1867_s22 }
 0x336   : > { %p1870_p11 = scmp.lt.s32.totalorder %s1868_s1, %s1862_s24 }
 0x337   : > { %v590_v55 = vpop.xlane.xlu1 %589 }
 0x338   : > { %1736 = vrcp.f32 %v590_v55  ;;  %p1871_p0 = por %p1870_p11, %p1869_p12 }
 0x33a   : > { %p1872_p4 = pnand %p1871_p0, %p1865_p2 }
 0x345   : > { %v1737_v56 = vpop.eup %1736 }
 0x346   : > { %v592_v57 = vmul.f32 %v1737_v56, %v1729_v37 }
 0x348   : > { %593 = vst.msk [vmem:[%s2266_s27] sm:$0xff] %vm505_vm3, %v592_v57  ;;  %1571 = vmatmul.mubr.msk.f32.vlgmr.msra.gmra.mxu1 %vm505_vm3, %v592_v57 }
 0x349   : > { %1580 = vmatprep.mubr.msk.f32.mxu1 %vm1992_vm0, %v1991_v0 }
 0x39f   : > { %v761_v58 = vpop.xlane.xlu0 %760 }
 0x3a0   : > { %1738 = vrcp.f32 %v761_v58 }
 0x3a3   : > { %v938_v59 = vpop.xlane.xlu1 %937 }
 0x3a4   : > { %1740 = vrcp.f32 %v938_v59 }
 0x3a7   : > { %v1115_v60 = vpop.xlane.xlu0 %1114  ;;  %v944_v63 = vpop.permute.xlu1 %943 }
 0x3a8   : > { %1742 = vrcp.f32 %v1115_v60 }
 0x3ab   : > { %v767_v61 = vpop.permute.xlu0 %766  ;;  %v1121_v4 = vpop.permute.xlu1 %1120 }
 0x3ac   : > { %1579 = vmatpush3.msra.mxu1 %v767_v61 }
 0x3ad   : > { %v1739_v62 = vpop.eup %1738  ;;  %1588 = vmatprep.subr.mxu1 %v1991_v0 }
 0x3ae   : > { %v763_v1 = vmul.f32 %v1739_v62, %v1731_v49 }
 0x3b0   : > { %1490 = vst.msk [vmem:[%s2266_s27 + $0x8] sm:$0xff] %vm505_vm3, %v763_v1  ;;  %1581 = vmatmul.mubr.msk.f32.vlgmr.msra.gmra.mxu1 %vm505_vm3, %v763_v1 }
 0x3b1   : > { %v1741_v2 = vpop.eup %1740  ;;  %1589 = vmatpush3.msra.mxu1 %v944_v63  ;;  %1590 = vmatprep.mubr.msk.f32.mxu1 %vm1992_vm0, %v1991_v0 }
 0x3b2   : > { %1598 = vmatprep.subr.mxu1 %v1991_v0  ;;  %v940_v3 = vmul.f32 %v1741_v2, %v1733_v51 }
 0x3b4   : > { %1494 = vst.msk [vmem:[%s2266_s27 + $0x10] sm:$0xff] %vm505_vm3, %v940_v3  ;;  %1591 = vmatmul.mubr.msk.f32.vlgmr.msra.gmra.mxu1 %vm505_vm3, %v940_v3 }
 0x3b5   : > { %v1743_v5 = vpop.eup %1742  ;;  %1599 = vmatpush3.msra.mxu1 %v1121_v4  ;;  %1600 = vmatprep.mubr.msk.f32.mxu1 %vm1992_vm0, %v1991_v0 }
 0x3b6   : > { %v1117_v6 = vmul.f32 %v1743_v5, %v1735_v53 }
 0x3b8   : > { %1498 = vst.msk [vmem:[%s2266_s27 + $0x18] sm:$0xff] %vm505_vm3, %v1117_v6  ;;  %1601 = vmatmul.mubr.msk.f32.vlgmr.msra.gmra.mxu1 %vm505_vm3, %v1117_v6 }
 0x408   : > { %v666_v7 = vpop.f32.mrf.mxu1 }
 0x409   : > { %670 = vst.msk [vmem:[#allocation4] sm:$0xff] %vm505_vm3, %v666_v7 }
 0x40a   : > { %v1572_v8 = vpop.f32.mrf.mxu1 }
 0x470   : > { %v838_v12 = vpop.f32.mrf.mxu1 }
 0x471   : > { %843 = vrot.lane.b32.xlu0 %v838_v12, %s2000_s15 }
 0x472   : > { %v1582_v14 = vpop.f32.mrf.mxu1 }
 0x474   : > { %v1015_v15 = vpop.f32.mrf.mxu1 }
 0x475   : > { %1020 = vrot.lane.b32.xlu1 %v1015_v15, %s2001_s25 }
 0x476   : > { %v1592_v16 = vpop.f32.mrf.mxu1 }
 0x478   : > { %v1192_v17 = vpop.f32.mrf.mxu1 }
 0x479   : > { %1197 = vrot.lane.b32.xlu0 %v1192_v17, %s2002_s28 }
 0x47a   : > { %v1602_v18 = vpop.f32.mrf.mxu1 }
 0x4e3   : > { %v844_v19 = vpop.permute.xlu0 %843 }
 0x4e4   : > { %847 = vst.msk [vmem:[#allocation4] sm:$0xff] %vm846_vm4, %v844_v19 }
 0x4e7   : > { %v1021_v20 = vpop.permute.xlu1 %1020 }
 0x4e8   : > { %1024 = vst.msk [vmem:[#allocation4] sm:$0xff] %vm1023_vm5, %v1021_v20 }
 0x4eb   : > { %v1198_v0 = vpop.permute.xlu0 %1197 }
 0x4ec   : > { %1201 = vst.msk [vmem:[#allocation4] sm:$0xff] %vm1200_vm6, %v1198_v0 }
 0x4f3   : > { %v1202_v21 = vld [vmem:[#allocation4] sm:$0xff] }
 0x4f4   : > { %1612 = vmatmul.mubr.msk.f32.vlgmr.msra.gmra.mxu0 %vm352_vm1, %v1202_v21 }
 0x4f5   : > { %1875 = shalt.err (!%p1872_p4)
}
 0x4f6   : > { %s1876_s27 = scalar_lea.hbm %s2299_s18, 512  ;;  %s1880_s21 = scalar_lea.hbm %s2387_s8, 1024 }
 0x4f7   : > { %p1877_p6 = scmp.ne.s32.totalorder %s2299_s18, %s1876_s27  ;;  %p1881_p3 = scmp.lt.s32.totalorder %s2299_s18, %s2387_s8 }
 0x4f8   : > { %p1882_p10 = scmp.lt.s32.totalorder %s1880_s21, %s1876_s27 }
 0x4f9   : > { %p1878_p9 = pnand %p1877_p6, %p2154_p5 }
 0x4fa   : > { %p1883_p8 = por %p1882_p10, %p1881_p3 }
 0x4fb   : > { %p1879_p13 = pneg %p1878_p9 }
 0x4fd   : > { %p1884_p1 = pnand %p1883_p8, %p1879_p13 }
 0x4ff   : > { %1887 = shalt.err (!%p1884_p1)
}
 0x500   : > { %s2004_s24 = smov 128   ;;  %v1500_v22 = vld [vmem:[%s2385_s6] ss:$0 sm:$0xff]  ;;  %s1504_s1 = sshll.u32 %s1974_s11, 7 }
 0x501   : > { %1629 = dma.vmem_to_hbm [thread:$0]  (%p2154_p5), %s2301_s4, 512, %s2299_s18, %s1294_s20, %s2004_s24, %s2004_s24, %s2000_s15  }
 0x502   : > { %s339_s27 = scalar_lea.vmem [#allocation16], %s1477_s26  ;;  %s2336_s3 = scalar_lea.hbm %s2386_s7, %s1504_s1 }
 0x503   : > { %s1308_s25 = sshll.u32 %s339_s27, 4  ;;  %s1289_s15 = scalar_lea.sflag [#allocation10], %s2184_s14  ;;  %s1309_s25 = int_to_ptr.vmem [resolvable:$true] %s1308_s25 }
 0x504   : > { %s1888_s4 = scalar_lea.vmem %s1309_s25, 128  ;;  %s2005_s11 = smov [#allocation16]  }
 0x505   : > { %p1889_p7 = scmp.ne.s32.totalorder %s1309_s25, %s1888_s4  ;;  %s1892_s26 = sshll.u32 %s2005_s11, 4  ;;  %s1893_s26 = int_to_ptr.vmem [resolvable:$false] %s1892_s26 }
 0x506   : > { %s1894_s18 = scalar_lea.vmem %s1893_s26, 256  ;;  %p1895_p11 = scmp.lt.s32.totalorder %s1309_s25, %s1893_s26 }
 0x507   : > { %p1890_p2 = pnand %p1889_p7, %p2154_p5  ;;  %p1896_p0 = scmp.lt.s32.totalorder %s1894_s18, %s1888_s4 }
 0x509   : > { %p1891_p12 = pneg %p1890_p2  ;;  %p1897_p4 = por %p1896_p0, %p1895_p11 }
 0x50b   : > { %p1898_p6 = pnand %p1897_p4, %p1891_p12 }
 0x5b4   : > { %v1283_v23 = vpop.f32.mrf.mxu0 }
 0x5b5   : > { %v1284_v24 = vadd.f32 %v1500_v22, %v1283_v23 }
 0x5b6   : > { %v1613_v25 = vpop.f32.mrf.mxu0 }
 0x5b7   : > { %1287 = vst.msk [vmem:[%s339_s27] sm:$0xff] %vm352_vm1, %v1284_v24 }
 0x5b8   : > { %1901 = shalt.err (!%p1898_p6)
}
 0x5b9   : > { %s1902_s20 = scalar_lea.hbm %s2336_s3, 128  ;;  %s1906_s24 = scalar_lea.hbm %s2386_s7, 256 }
 0x5ba   : > { %p1903_p9 = scmp.ne.s32.totalorder %s2336_s3, %s1902_s20  ;;  %p1907_p10 = scmp.lt.s32.totalorder %s2336_s3, %s2386_s7 }
 0x5bb   : > { %p1908_p8 = scmp.lt.s32.totalorder %s1906_s24, %s1902_s20 }
 0x5bc   : > { %p1904_p13 = pnand %p1903_p9, %p2154_p5 }
 0x5bd   : > { %p1909_p1 = por %p1908_p8, %p1907_p10 }
 0x5be   : > { %p1905_p3 = pneg %p1904_p13 }
 0x5c0   : > { %p1910_p7 = pnand %p1909_p1, %p1905_p3 }
 0x5c2   : > { %1913 = shalt.err (!%p1910_p7)
}
 0x5c3   : > { %1628 = dma.vmem_to_hbm [thread:$0]  (%p2154_p5), %s1309_s25, 128, %s2336_s3, %s1289_s15  }
 0x5c4 PF: > { %s1337_s1 = sand.u32 1, %s1962_s0   ;;  %p2407_p2 = scmp.ne.s32.totalorder %s2397_s19, 0 }
 0x5c5   : > { %p2408_p12 = scmp.ge.s32.totalorder %s1982_s13, 2  ;;  %s1338_s27 = scalar_lea.sflag [#allocation10], %s1337_s1 }
 0x5c7   : > { %p1647_p11 = pnand %p2408_p12, %p2407_p2 }
 0x5c9   : > { %p1648_p0 = pneg %p1647_p11 }
 0x5cb   : > { %1953 = dma.done.wait (%p1648_p0), %s1338_s27, 128  }
 0x5cc   : > { %1955 = vsyncadd (%p1648_p0), %s1338_s27, 4294967168  ;;  %s1347_s28 = scalar_lea.sflag [#allocation18], %s1337_s1 }
 0x5cd   : > { %1957 = dma.done.wait (%p1648_p0), %s1347_s28, 512  }
 0x5ce   : > { %1959 = vsyncadd (%p1648_p0), %s1347_s28, 4294966784  ;;  %s37_s13 = sadd.s32 1, %s1982_s13   ;;  %s2409_s0 = smov %s1966_s9 }
 0x5cf   : > { %p34_p4 = scmp.ge.s32.totalorder %s37_s13, 4   ;;  %s2410_s9 = smov %s1970_s10 }
 0x5d0   : > { %s2411_s10 = smov %s2166_s29  ;;  %s2412_s11 = smov %s1978_s12 }
 0x5d1   : > { %s2413_s12 = smov %s2415_s30  ;;  %36 = sbr.rel (!%p34_p4) target bundleno = 26 (0x1a), region = 117 }
 0x5d6   :  { %1352 = vsyncpa [#allocation9], 1 }
 0x5d7   :  { %1354 = vsyncpa [#allocation9 + $0x1], 1 }
 0x5d8   :  { %1355 = vsyncpa [#allocation12], 1 }
 0x5d9   :  { %1356 = vsyncpa [#allocation15], 1 }
 0x5da   :  { %1357 = vsyncpa [#allocation10], 1 }
 0x5db   :  { %1359 = vsyncpa [#allocation10 + $0x1], 1 }
 0x5dc   :  { %1360 = vsyncpa [#allocation18], 1 }
 0x5dd   :  { %1362 = vsyncpa [#allocation18 + $0x1], 1 }

</bundles_post_ra>
